<compile_context>
chip_gen: v7x
topology: tpu7x:2x2x1
jax: 0.10.0
libtpu: 0.0.40
codegen_flags: <defaults>
</compile_context>

<pallas_src>
import functools
import math

import jax
import jax.numpy as jnp
from jax.experimental import pallas as pl
from jax.experimental.pallas import tpu as pltpu


def _round_up(x, m):
    return ((x + m - 1) // m) * m


def _qfl_kernel(pred_ref, gt_ref, mask_ref, out_ref, *, beta):
    x = pred_ref[...].astype(jnp.float32)
    y = gt_ref[...].astype(jnp.float32)
    m = mask_ref[...]
    if m.dtype != jnp.bool_:
        m = m != 0

    # Numerically stable softplus(x) == BCEWithLogits(x, target=0):
    #   max(x, 0) + log1p(exp(-|x|))
    bce_zero = jnp.maximum(x, 0.0) + jnp.log1p(jnp.exp(-jnp.abs(x)))
    # sigmoid(x) = exp(x - softplus(x)); exponent <= 0 so exp never overflows.
    sig = jnp.exp(x - bce_zero)
    # BCEWithLogits(x, target=y) = softplus(x) - x*y
    bce_gt = bce_zero - x * y

    d = jnp.abs(y - sig)
    if beta == 2.0:
        # Specialized: squares run on the 4-wide VALU instead of EUP pow.
        w_neg = sig * sig
        w_pos = d * d
    else:
        w_neg = sig ** beta
        w_pos = d ** beta

    out_ref[...] = jnp.where(m, bce_gt * w_pos, bce_zero * w_neg).astype(out_ref.dtype)


def quality_focal_loss_yolo(pred_score, gt_score, gt_target_pos_mask,
                            beta=2.0, tile_rows=2048, out_dtype=None):
    """Pallas TPU implementation of QualityfocalLoss_YOLO.forward.

    pred_score, gt_score: (B, A, C) floats (f32 or bf16)
    gt_target_pos_mask:   (B, A, C) bool
    Returns the elementwise loss, shape (B, A, C), dtype = input dtype
    (override with out_dtype), matching reduction='none'.
    """
    assert pred_score.shape == gt_score.shape == gt_target_pos_mask.shape
    orig_shape = pred_score.shape
    total = int(math.prod(orig_shape))
    if out_dtype is None:
        out_dtype = pred_score.dtype

    # --- lane-dense layout: pick lanes so the reshape is zero-copy ----------
    lanes = None
    for cand in (512, 384, 256, 128):
        if total % cand == 0:
            lanes = cand
            break

    pred1 = jnp.ravel(pred_score)            # native dtype, no convert
    gt1 = jnp.ravel(gt_score)
    mask1 = jnp.ravel(gt_target_pos_mask)    # bool, 1 B/elem, no int8 convert

    if lanes is None:
        # Fallback for odd sizes: pad to a multiple of 128 lanes (copy pass).
        lanes = 128
        padded = _round_up(total, lanes)
        pad = padded - total
        pred1 = jnp.pad(pred1, (0, pad))
        gt1 = jnp.pad(gt1, (0, pad))
        mask1 = jnp.pad(mask1, (0, pad))
    else:
        padded = total
        pad = 0

    rows = padded // lanes

    # --- tile-row heuristic --------------------------------------------------
    # Small tensors: one whole-array block (block dims == full dims is legal).
    # Larger tensors: >=~8 grid steps (megacore sharding + pipelining), rows
    # multiple of 32 (bool/int8 sublane packing), capped at tile_rows so the
    # double-buffered working set stays < 32 MiB scoped VMEM on every gen.
    if rows <= 32:
        tr = rows
    else:
        tr = min(int(tile_rows), _round_up(pl.cdiv(rows, 8), 32))
        tr = max(32, (tr // 32) * 32)
    grid = (pl.cdiv(rows, tr),)   # ragged final block handled by Pallas

    pred2 = pred1.reshape(rows, lanes)
    gt2 = gt1.reshape(rows, lanes)
    mask2 = mask1.reshape(rows, lanes)

    blk = pl.BlockSpec((tr, lanes), lambda i: (i, 0))

    in_bytes = padded * (pred_score.dtype.itemsize + gt_score.dtype.itemsize + 1)
    out_bytes = padded * jnp.dtype(out_dtype).itemsize
    cost = pl.CostEstimate(
        flops=20 * padded,
        transcendentals=3 * padded,
        bytes_accessed=in_bytes + out_bytes,
    )

    out2 = pl.pallas_call(
        functools.partial(_qfl_kernel, beta=float(beta)),
        out_shape=jax.ShapeDtypeStruct((rows, lanes), out_dtype),
        grid_spec=pltpu.PrefetchScalarGridSpec(
            num_scalar_prefetch=0,
            grid=grid,
            in_specs=[blk, blk, blk],
            out_specs=blk,
        ),
        compiler_params=pltpu.CompilerParams(
            dimension_semantics=("parallel",),
            vmem_limit_bytes=32 * 1024 * 1024,
        ),
        cost_estimate=cost,
    )(pred2, gt2, mask2)

    out1 = out2.reshape(padded)
    if pad:
        out1 = out1[:total]
    return out1.reshape(orig_shape)


def _reference(pred_score, gt_score, mask, beta=2.0):
    """Pure-JAX reference mirroring the PyTorch forward (f32 math)."""
    x = pred_score.astype(jnp.float32)
    y = gt_score.astype(jnp.float32)
    sig = jax.nn.sigmoid(x)
    sp = jnp.log1p(jnp.exp(-jnp.abs(x)))
    bce0 = jnp.maximum(x, 0.0) + sp
    bcet = jnp.maximum(x, 0.0) - x * y + sp
    neg = bce0 * sig ** beta
    pos = bcet * jnp.abs(y - sig) ** beta
    return jnp.where(mask, pos, neg)


if __name__ == "__main__":
    key = jax.random.PRNGKey(0)

    # Case 1: total is a multiple of 512 -> zero-copy path, single block.
    k1, k2, k3 = jax.random.split(key, 3)
    B, A, C = 2, 64, 16
    pred_score = jax.random.normal(k1, (B, A, C), dtype=jnp.float32) * 2.0
    gt_score = jax.random.uniform(k2, (B, A, C), dtype=jnp.float32)
    gt_target_pos_mask = jax.random.uniform(k3, (B, A, C)) > 0.8

    loss = quality_focal_loss_yolo(pred_score, gt_score, gt_target_pos_mask, beta=2.0)
    loss = jax.block_until_ready(loss)
    ref = _reference(pred_score, gt_score, gt_target_pos_mask, beta=2.0)
    assert loss.shape == (B, A, C) and loss.dtype == pred_score.dtype
    assert jnp.allclose(loss, ref, atol=1e-5, rtol=1e-5)

    # Case 2: odd size -> pad fallback + ragged final row-block, beta=1.5.
    k4, k5, k6 = jax.random.split(jax.random.PRNGKey(0), 3)
    B2, A2, C2 = 2, 105, 20
    pred2 = jax.random.normal(k4, (B2, A2, C2), dtype=jnp.float32) * 2.0
    gt2 = jax.random.uniform(k5, (B2, A2, C2), dtype=jnp.float32)
    mask2 = jax.random.uniform(k6, (B2, A2, C2)) > 0.7

    loss2 = quality_focal_loss_yolo(pred2, gt2, mask2, beta=1.5)
    loss2 = jax.block_until_ready(loss2)
    ref2 = _reference(pred2, gt2, mask2, beta=1.5)
    assert loss2.shape == (B2, A2, C2)
    assert jnp.allclose(loss2, ref2, atol=1e-5, rtol=1e-5)

    # Case 3: bf16 inputs -> lanes=384 zero-copy path, bf16 output (f32 math).
    k7, k8, k9 = jax.random.split(jax.random.PRNGKey(1), 3)
    B3, A3, C3 = 2, 84, 80
    pred3 = (jax.random.normal(k7, (B3, A3, C3), dtype=jnp.float32) * 2.0).astype(jnp.bfloat16)
    gt3 = jax.random.uniform(k8, (B3, A3, C3), dtype=jnp.float32).astype(jnp.bfloat16)
    mask3 = jax.random.uniform(k9, (B3, A3, C3)) > 0.8

    loss3 = quality_focal_loss_yolo(pred3, gt3, mask3, beta=2.0)
    loss3 = jax.block_until_ready(loss3)
    ref3 = _reference(pred3, gt3, mask3, beta=2.0)
    assert loss3.shape == (B3, A3, C3) and loss3.dtype == jnp.bfloat16
    assert jnp.allclose(loss3.astype(jnp.float32), ref3, atol=2e-2, rtol=2e-2)

    print("KERNEL_OK")
</pallas_src>

<mosaic_0001>
module attributes {stable_mosaic.version = 11 : i64} {
  func.func @_qfl_kernel(%arg0: i32, %arg1: memref<4x512xf32, #tpu.memory_space<vmem>>, %arg2: memref<4x512xf32, #tpu.memory_space<vmem>>, %arg3: memref<4x512xi32, #tpu.memory_space<vmem>>, %arg4: memref<4x512xf32, #tpu.memory_space<vmem>>) attributes {dimension_semantics = [#tpu.dimension_semantics<parallel>], iteration_bounds = array<i64: 1>, scalar_prefetch = 0 : i64, scratch_operands = 0 : i64, tpu.core_type = #tpu.core_type<tc>, window_params = [{transform_indices = @transform_0, window_bounds = array<i64: 4, 512>}, {transform_indices = @transform_1, window_bounds = array<i64: 4, 512>}, {transform_indices = @transform_2, window_bounds = array<i64: 4, 512>}, {transform_indices = @transform_3, window_bounds = array<i64: 4, 512>}]} {
    %c0 = arith.constant 0 : index
    %c0_0 = arith.constant 0 : index
    %0 = vector.load %arg1[%c0, %c0_0] : memref<4x512xf32, #tpu.memory_space<vmem>>, vector<4x512xf32>
    %c0_1 = arith.constant 0 : index
    %c0_2 = arith.constant 0 : index
    %1 = vector.load %arg2[%c0_1, %c0_2] : memref<4x512xf32, #tpu.memory_space<vmem>>, vector<4x512xf32>
    %c0_3 = arith.constant 0 : index
    %c0_4 = arith.constant 0 : index
    %2 = vector.load %arg3[%c0_3, %c0_4] : memref<4x512xi32, #tpu.memory_space<vmem>>, vector<4x512xi32>
    %cst = arith.constant dense<0> : vector<4x512xi32>
    %3 = arith.cmpi ne, %2, %cst : vector<4x512xi32>
    %cst_5 = arith.constant 0.000000e+00 : f32
    %4 = vector.broadcast %cst_5 : f32 to vector<4x512xf32>
    %5 = arith.maximumf %0, %4 : vector<4x512xf32>
    %6 = math.absf %0 : vector<4x512xf32>
    %cst_6 = arith.constant 0.000000e+00 : f32
    %7 = vector.broadcast %cst_6 : f32 to vector<4x512xf32>
    %8 = arith.subf %7, %6 : vector<4x512xf32>
    %9 = math.exp %8 : vector<4x512xf32>
    %10 = math.log1p %9 : vector<4x512xf32>
    %11 = arith.addf %5, %10 : vector<4x512xf32>
    %12 = arith.subf %0, %11 : vector<4x512xf32>
    %13 = math.exp %12 : vector<4x512xf32>
    %14 = arith.mulf %0, %1 : vector<4x512xf32>
    %15 = arith.subf %11, %14 : vector<4x512xf32>
    %16 = arith.subf %1, %13 : vector<4x512xf32>
    %17 = math.absf %16 : vector<4x512xf32>
    %18 = arith.mulf %13, %13 : vector<4x512xf32>
    %19 = arith.mulf %17, %17 : vector<4x512xf32>
    %20 = arith.mulf %15, %19 : vector<4x512xf32>
    %21 = arith.mulf %11, %18 : vector<4x512xf32>
    %22 = arith.select %3, %20, %21 : vector<4x512xi1>, vector<4x512xf32>
    %c0_7 = arith.constant 0 : index
    %c0_8 = arith.constant 0 : index
    %23 = vector.load %arg4[%c0_7, %c0_8] : memref<4x512xf32, #tpu.memory_space<vmem>>, vector<4x512xf32>
    tpu.vector_store %arg4[%c0_7, %c0_8], %22 {strides = array<i32>} : memref<4x512xf32, #tpu.memory_space<vmem>>, vector<4x512xf32>,
    return
  }
  func.func @transform_0(%arg0: i32) -> (i32, i32) {
    %c0_i32 = arith.constant 0 : i32
    %c0_i32_0 = arith.constant 0 : i32
    return %arg0, %c0_i32 : i32, i32
  }
  func.func @transform_1(%arg0: i32) -> (i32, i32) {
    %c0_i32 = arith.constant 0 : i32
    %c0_i32_0 = arith.constant 0 : i32
    return %arg0, %c0_i32 : i32, i32
  }
  func.func @transform_2(%arg0: i32) -> (i32, i32) {
    %c0_i32 = arith.constant 0 : i32
    %c0_i32_0 = arith.constant 0 : i32
    return %arg0, %c0_i32 : i32, i32
  }
  func.func @transform_3(%arg0: i32) -> (i32, i32) {
    %c0_i32 = arith.constant 0 : i32
    %c0_i32_0 = arith.constant 0 : i32
    return %arg0, %c0_i32 : i32, i32
  }
}

</mosaic_0001>

<bundles_post_ra>
// kernel: tpu_custom_call.1
= control target key start
LH: loop header
LB: loop body
LE: loop exit
PB: predicated region body
PF: predicated region fallthrough
CT: control target
= control target key end

     0   :  { %8 = vsyncpa [#allocation3], 0  ;;  %s226_s0 = inlined_call_operand.vmem [shape: f32[4,512], index: 0, kind: input, shape index: {}]   ;;  %s227_s1 = inlined_call_operand.hbm [shape: f32[4,512], index: 1, kind: input, shape index: {}]   ;;  %s228_s2 = inlined_call_operand.vmem [shape: s32[4,512], index: 2, kind: input, shape index: {}]   ;;  %s229_s3 = inlined_call_operand.hbm [shape: f32[4,512], index: 3, kind: output, shape index: {}]  }
   0x1   :  { %9 = vsyncpa [#allocation4], 0  ;;  %s168_s12 = smov [#allocation2]   ;;  %s120_s16 = scalar_lea.hbm %s227_s1, 256 }
   0x2   :  { %s18_s13 = sshll.u32 %s168_s12, 4  ;;  %p121_p0 = scmp.ne.s32.totalorder %s227_s1, %s120_s16  ;;  %s19_s13 = int_to_ptr.vmem [resolvable:$true] %s18_s13 }
   0x3   :  { %p124_p1 = scmp.lt.u32.totalorder %s120_s16, %s227_s1 }
   0x5   :  { %p126_p2 = pnand %p124_p1, %p121_p0 }
   0x7   :  { %129 = shalt.err (!%p126_p2)
}
   0x8   :  { %s130_s21 = scalar_lea.vmem %s19_s13, 256  ;;  %p135_p4 = scmp.lt.s32.totalorder %s19_s13, %s19_s13 }
   0x9   :  { %p131_p3 = scmp.ne.s32.totalorder %s19_s13, %s130_s21  ;;  %p136_p5 = scmp.lt.s32.totalorder %s130_s21, %s130_s21 }
   0xb   :  { %p137_p6 = por %p136_p5, %p135_p4 }
   0xd   :  { %p138_p7 = pnand %p137_p6, %p131_p3 }
   0xf   :  { %141 = shalt.err (!%p138_p7)
}
  0x10   :  { %21 = dma.hbm_to_vmem [thread:$0]  %s227_s1, 256, %s19_s13, [#allocation3]  }
  0x11   :  { %164 = dma.done.wait [#allocation3], 256  }
  0x12   :  { %165 = vsyncadd [#allocation3], 4294967040  ;;  %v27_v0 = vld [vmem:[%s226_s0] sm:$0xff]  ;;  %v28_v2 = vld [vmem:[%s226_s0 + $0x8] sm:$0xff]  ;;  %s169_s30 = smov [#allocation5]  }
  0x13   :  { %v37_v1 = vand.u32 2147483647, %v27_v0  ;;  %v38_v3 = vand.u32 2147483647, %v28_v2  ;;  %v35_v20 = vmax.f32 %v27_v0, 0.0  ;;  %v36_v24 = vmax.f32 %v28_v2, 0.0 }
  0x14   :  { %v29_v34 = vld [vmem:[#allocation2] sm:$0xff]  ;;  %v30_v36 = vld [vmem:[#allocation2 + $0x8] sm:$0xff]  ;;  %s97_s4 = sshll.u32 %s169_s30, 4  ;;  %s98_s4 = int_to_ptr.vmem [resolvable:$true] %s97_s4 }
  0x15   :  { %v39_v4 = vsub.f32 0.0, %v37_v1  ;;  %v40_v5 = vsub.f32 0.0, %v38_v3  ;;  %v71_v35 = vmul.f32 %v29_v34, %v27_v0  ;;  %v72_v38 = vmul.f32 %v30_v36, %v28_v2  ;;  %v31_v44 = vld [vmem:[%s228_s2] sm:$0xff]  ;;  %v32_v47 = vld [vmem:[%s228_s2 + $0x8] sm:$0xff]  ;;  %s142_s5 = scalar_lea.vmem %s98_s4, 256  ;;  %p147_p9 = scmp.lt.s32.totalorder %s98_s4, %s98_s4 }
  0x16   :  { %vm33_vm2 = vcmp.ne.s32.totalorder %v31_v44, 0  ;;  %vm34_vm3 = vcmp.ne.s32.totalorder %v32_v47, 0  ;;  %p143_p8 = scmp.ne.s32.totalorder %s98_s4, %s142_s5  ;;  %p148_p10 = scmp.lt.s32.totalorder %s142_s5, %s142_s5 }
  0x17   :  { %v41_v6 = vmul.f32 1.442695, %v39_v4  ;;  %v43_v7 = vmul.f32 1.442695, %v40_v5 }
  0x18   :  { %p149_p11 = por %p148_p10, %p147_p9 }
  0x19   :  { %108 = vpow2.f32 %v41_v6 }
  0x1a   :  { %110 = vpow2.f32 %v43_v7  ;;  %p150_p12 = pnand %p149_p11, %p143_p8 }
  0x23   :  { %v109_v8 = vpop.eup %108 }
  0x24   :  { %v111_v9 = vpop.eup %110  ;;  %v45_v10 = vadd.f32 1.0, %v109_v8  ;;  %v48_v12 = vmul.f32 -0.5, %v109_v8  ;;  %v51_v15 = vand.u32 2147483647, %v109_v8 }
  0x25   :  { %v54_v11 = vadd.f32 1.0, %v111_v9  ;;  %v57_v13 = vmul.f32 -0.5, %v111_v9  ;;  %v60_v17 = vand.u32 2147483647, %v111_v9 }
  0x26   :  { %112 = vlog2.f32 %v45_v10  ;;  %v49_v14 = vadd.f32 1.0, %v48_v12  ;;  %vm52_vm0 = vcmp.lt.f32.partialorder %v51_v15, 0.0004427343 }
  0x27   :  { %114 = vlog2.f32 %v54_v11  ;;  %v58_v16 = vadd.f32 1.0, %v57_v13  ;;  %vm61_vm1 = vcmp.lt.f32.partialorder %v60_v17, 0.0004427343 }
  0x28   :  { %v50_v18 = vmul.f32 %v109_v8, %v49_v14 }
  0x29   :  { %v59_v21 = vmul.f32 %v111_v9, %v58_v16 }
  0x30   :  { %v113_v19 = vpop.eup %112 }
  0x31   :  { %v115_v22 = vpop.eup %114  ;;  %v47_v23 = vmul.f32 0.6931472, %v113_v19 }
  0x32   :  { %v56_v25 = vmul.f32 0.6931472, %v115_v22 }
  0x33   :  { %v53_v26 = vsel %vm52_vm0, %v50_v18, %v47_v23 }
  0x34   :  { %v63_v27 = vadd.f32 %v53_v26, %v35_v20  ;;  %v62_v28 = vsel %vm61_vm1, %v59_v21, %v56_v25 }
  0x35   :  { %v64_v29 = vadd.f32 %v62_v28, %v36_v24 }
  0x36   :  { %v65_v30 = vsub.f32 %v27_v0, %v63_v27  ;;  %v73_v45 = vsub.f32 %v63_v27, %v71_v35 }
  0x37   :  { %v66_v31 = vsub.f32 %v28_v2, %v64_v29  ;;  %v74_v48 = vsub.f32 %v64_v29, %v72_v38 }
  0x38   :  { %v67_v32 = vmul.f32 1.442695, %v65_v30 }
  0x39   :  { %v69_v33 = vmul.f32 1.442695, %v66_v31 }
  0x3a   :  { %116 = vpow2.f32 %v67_v32 }
  0x3b   :  { %118 = vpow2.f32 %v69_v33 }
  0x44   :  { %v117_v37 = vpop.eup %116 }
  0x45   :  { %v119_v39 = vpop.eup %118  ;;  %v75_v40 = vsub.f32 %v29_v34, %v117_v37  ;;  %v79_v41 = vmul.f32 %v117_v37, %v117_v37 }
  0x46   :  { %v76_v42 = vsub.f32 %v30_v36, %v119_v39  ;;  %v80_v43 = vmul.f32 %v119_v39, %v119_v39 }
  0x47   :  { %v77_v46 = vand.u32 2147483647, %v75_v40  ;;  %v85_v51 = vmul.f32 %v79_v41, %v63_v27 }
  0x48   :  { %v78_v49 = vand.u32 2147483647, %v76_v42  ;;  %v86_v53 = vmul.f32 %v80_v43, %v64_v29 }
  0x49   :  { %v81_v50 = vmul.f32 %v77_v46, %v77_v46 }
  0x4a   :  { %v82_v52 = vmul.f32 %v78_v49, %v78_v49 }
  0x4b   :  { %v83_v54 = vmul.f32 %v81_v50, %v73_v45 }
  0x4c   :  { %v84_v55 = vmul.f32 %v82_v52, %v74_v48 }
  0x4d   :  { %v87_v56 = vsel %vm33_vm2, %v83_v54, %v85_v51 }
  0x4e   :  { %89 = vst [vmem:[#allocation5] sm:$0xff] %v87_v56  ;;  %v88_v57 = vsel %vm34_vm3, %v84_v55, %v86_v53 }
  0x4f   :  { %90 = vst [vmem:[#allocation5 + $0x8] sm:$0xff] %v88_v57 }
  0x50   :  { %153 = shalt.err (!%p150_p12)
}
  0x51   :  { %s154_s7 = scalar_lea.hbm %s229_s3, 256 }
  0x52   :  { %p155_p13 = scmp.ne.s32.totalorder %s229_s3, %s154_s7  ;;  %p158_p0 = scmp.lt.u32.totalorder %s154_s7, %s229_s3 }
  0x54   :  { %p160_p1 = pnand %p158_p0, %p155_p13 }
  0x56   :  { %163 = shalt.err (!%p160_p1)
}
  0x57   :  { %100 = dma.vmem_to_hbm [thread:$0]  %s98_s4, 256, %s229_s3, [#allocation4]  }
  0x58   :  { %166 = dma.done.wait [#allocation4], 256  }
  0x59   :  { %167 = vsyncadd [#allocation4], 4294967040 }
  0x5a   :  { %104 = vsyncpa [#allocation3], 1 }
  0x5b   :  { %105 = vsyncpa [#allocation4], 1 }

</bundles_post_ra>
